<compile_context>
chip_gen: v7x
topology: tpu7x:2x2x1
jax: 0.10.0
libtpu: 0.0.40
codegen_flags: <defaults>
</compile_context>

<pallas_src>
import functools

import jax
import jax.numpy as jnp
from jax import lax
from jax.experimental import pallas as pl
from jax.experimental.pallas import tpu as pltpu


def _dynamic_linear_block_kernel(*refs, dropout_rate, activation, eps,
                                 apply_dropout, use_bn):
    if use_bn:
        seed_ref, x_ref, w_ref, gamma_ref, beta_ref, o_ref = refs
    else:
        seed_ref, x_ref, w_ref, b_ref, o_ref = refs

    # ---- Linear: (B, F_in) @ (F_in, F_out) on the MXU ----------------------
    y = jnp.dot(x_ref[...], w_ref[...], preferred_element_type=jnp.float32)

    if use_bn:
        # Bias is mathematically cancelled by the mean subtraction -> skipped.
        # BatchNorm1d training-mode batch statistics (biased variance, as in
        # the PyTorch forward).  Reuse the centered tensor so normalization is
        # a single FMA per element.
        mean = jnp.mean(y, axis=0, keepdims=True)                      # (1, F)
        centered = y - mean                                            # (B, F)
        var = jnp.mean(jnp.square(centered), axis=0, keepdims=True)    # (1, F)
        scale = gamma_ref[...] * lax.rsqrt(var + eps)                  # (1, F)
        y = centered * scale + beta_ref[...]
    else:
        y = y + b_ref[...]

    # ---- Activation ---------------------------------------------------------
    if activation == 'ReLU':
        y = jnp.maximum(y, 0.0)
    elif activation == 'LeakyReLU':
        y = jnp.where(y >= 0.0, y, 0.01 * y)     # PyTorch default slope
    else:  # ELU, alpha = 1.0
        y = jnp.where(y >= 0.0, y, jnp.expm1(jnp.minimum(y, 0.0)))

    # ---- Dropout (inverted scaling, training semantics) ---------------------
    # TODO(synk): cannot reproduce PyTorch's exact dropout RNG stream; uses a
    # deterministic counter-based hash keyed by `seed` (same Bernoulli(1-p)
    # semantics).  Caller should vary `seed` per step / per layer.
    if apply_dropout and dropout_rate > 0.0:
        rows = lax.broadcasted_iota(jnp.uint32, y.shape, 0)
        cols = lax.broadcasted_iota(jnp.uint32, y.shape, 1)
        h = rows * jnp.uint32(y.shape[1]) + cols
        h = h + seed_ref[0].astype(jnp.uint32) * jnp.uint32(0x9E3779B9)
        # murmur3 finalizer (pure VPU int ops; portable across chips).
        h = h ^ (h >> 16)
        h = h * jnp.uint32(0x85EBCA6B)
        h = h ^ (h >> 13)
        h = h * jnp.uint32(0xC2B2AE35)
        h = h ^ (h >> 16)
        thr = jnp.uint32(min(int(round(dropout_rate * 2.0 ** 32)), 2 ** 32 - 1))
        keep = h >= thr                                   # P(keep) = 1 - p
        y = jnp.where(keep, y * (1.0 / (1.0 - dropout_rate)), 0.0)

    o_ref[...] = y.astype(o_ref.dtype)


def dynamic_linear_block(x, w_t, b, gamma, beta, seed, *,
                         dropout_rate, activation, training=True, eps=1e-5):
    """x: (B, F_in) f32; w_t: (F_in, F_out); b/gamma/beta: (1, F_out); seed: (1,) i32."""
    B, _ = x.shape
    F_out = w_t.shape[1]
    use_bn = B > 1  # mirrors the `x.size(0) > 1` guard in the PyTorch forward

    kernel = functools.partial(
        _dynamic_linear_block_kernel,
        dropout_rate=float(dropout_rate), activation=activation,
        eps=float(eps), apply_dropout=bool(training), use_bn=use_bn)

    smem = pl.BlockSpec(memory_space=pltpu.MemorySpace.SMEM)
    vmem = pl.BlockSpec(memory_space=pltpu.MemorySpace.VMEM)

    if use_bn:
        args = (seed, x, w_t, gamma, beta)          # bias not needed under BN
        in_specs = [smem, vmem, vmem, vmem, vmem]
    else:
        args = (seed, x, w_t, b)
        in_specs = [smem, vmem, vmem, vmem]

    return pl.pallas_call(
        kernel,
        out_shape=jax.ShapeDtypeStruct((B, F_out), x.dtype),
        in_specs=in_specs,
        out_specs=pl.BlockSpec(memory_space=pltpu.MemorySpace.VMEM),
    )(*args)


if __name__ == "__main__":
    # Module hyper-parameters (small, consistent with the forward pass).
    B, F_in, F_out = 8, 32, 128
    dropout_rate = 0.1
    activation_func = 'ReLU'

    key = jax.random.PRNGKey(0)
    kx, kw, kb, kg, kbt = jax.random.split(key, 5)

    # Deterministic parameter init (PyTorch stores Linear weight as (out, in)).
    x = jax.random.normal(kx, (B, F_in), dtype=jnp.float32)
    w_pt = jax.random.normal(kw, (F_out, F_in), dtype=jnp.float32) * 0.05
    b = jax.random.normal(kb, (1, F_out), dtype=jnp.float32) * 0.05
    gamma = 1.0 + 0.1 * jax.random.normal(kg, (1, F_out), dtype=jnp.float32)
    beta = 0.1 * jax.random.normal(kbt, (1, F_out), dtype=jnp.float32)
    seed = jnp.array([1234], dtype=jnp.int32)

    # Glue: pre-transpose weight so the kernel does x @ W_t.
    w_t = jnp.transpose(w_pt)  # (F_in, F_out)

    # Batch > 1 path (Linear -> BN -> ReLU -> Dropout).
    out = dynamic_linear_block(
        x, w_t, b, gamma, beta, seed,
        dropout_rate=dropout_rate, activation=activation_func, training=True)
    out = jax.block_until_ready(out)
    assert out.shape == (B, F_out) and out.dtype == jnp.float32
    assert bool(jnp.all(jnp.isfinite(out)))

    # Batch == 1 path (Linear + bias -> ReLU -> Dropout, BN skipped).
    out1 = dynamic_linear_block(
        x[:1], w_t, b, gamma, beta, seed,
        dropout_rate=dropout_rate, activation=activation_func, training=True)
    out1 = jax.block_until_ready(out1)
    assert out1.shape == (1, F_out)
    assert bool(jnp.all(jnp.isfinite(out1)))

    # Eval-mode path (dropout disabled) sanity check.
    out_eval = dynamic_linear_block(
        x, w_t, b, gamma, beta, seed,
        dropout_rate=dropout_rate, activation=activation_func, training=False)
    out_eval = jax.block_until_ready(out_eval)
    assert out_eval.shape == (B, F_out)
    assert bool(jnp.all(jnp.isfinite(out_eval)))

    print("KERNEL_OK")
</pallas_src>

<mosaic_0001>
module attributes {stable_mosaic.version = 11 : i64} {
  func.func @_dynamic_linear_block_kernel(%arg0: memref<1xi32, #tpu.memory_space<smem>>, %arg1: memref<8x32xf32, #tpu.memory_space<vmem>>, %arg2: memref<32x128xf32, #tpu.memory_space<vmem>>, %arg3: memref<1x128xf32, #tpu.memory_space<vmem>>, %arg4: memref<1x128xf32, #tpu.memory_space<vmem>>, %arg5: memref<8x128xf32, #tpu.memory_space<vmem>>) attributes {dimension_semantics = [], scalar_prefetch = 0 : i64, scratch_operands = 0 : i64, tpu.core_type = #tpu.core_type<tc>} {
    %c0 = arith.constant 0 : index
    %c0_0 = arith.constant 0 : index
    %0 = vector.load %arg1[%c0, %c0_0] : memref<8x32xf32, #tpu.memory_space<vmem>>, vector<8x32xf32>
    %c0_1 = arith.constant 0 : index
    %c0_2 = arith.constant 0 : index
    %1 = vector.load %arg2[%c0_1, %c0_2] : memref<32x128xf32, #tpu.memory_space<vmem>>, vector<32x128xf32>
    %cst = arith.constant dense<0.000000e+00> : vector<8x128xf32>
    %2 = tpu.matmul %0, %1, %cst {dimension_numbers = #tpu.dot_dimension_numbers<[1], [0], [0], [1], [0, 0, 1, 1], [], []>} : vector<8x32xf32>, vector<32x128xf32>, vector<8x128xf32> -> vector<8x128xf32>
    %cst_3 = arith.constant dense<0.000000e+00> : vector<128xf32>
    %3 = vector.multi_reduction <add>, %2, %cst_3 [0] : vector<8x128xf32> to vector<128xf32>
    %4 = vector.shape_cast %3 : vector<128xf32> to vector<1x128xf32>
    %cst_4 = arith.constant 8.000000e+00 : f32
    %5 = vector.broadcast %cst_4 : f32 to vector<1x128xf32>
    %6 = arith.divf %4, %5 : vector<1x128xf32>
    %7 = vector.broadcast %6 : vector<1x128xf32> to vector<8x128xf32>
    %8 = arith.subf %2, %7 : vector<8x128xf32>
    %9 = arith.mulf %8, %8 : vector<8x128xf32>
    %cst_5 = arith.constant dense<0.000000e+00> : vector<128xf32>
    %10 = vector.multi_reduction <add>, %9, %cst_5 [0] : vector<8x128xf32> to vector<128xf32>
    %11 = vector.shape_cast %10 : vector<128xf32> to vector<1x128xf32>
    %cst_6 = arith.constant 8.000000e+00 : f32
    %12 = vector.broadcast %cst_6 : f32 to vector<1x128xf32>
    %13 = arith.divf %11, %12 : vector<1x128xf32>
    %c0_7 = arith.constant 0 : index
    %c0_8 = arith.constant 0 : index
    %14 = vector.load %arg3[%c0_7, %c0_8] : memref<1x128xf32, #tpu.memory_space<vmem>>, vector<1x128xf32>
    %cst_9 = arith.constant 9.99999974E-6 : f32
    %15 = vector.broadcast %cst_9 : f32 to vector<1x128xf32>
    %16 = arith.addf %13, %15 : vector<1x128xf32>
    %17 = math.rsqrt %16 : vector<1x128xf32>
    %18 = arith.mulf %14, %17 : vector<1x128xf32>
    %19 = vector.broadcast %18 : vector<1x128xf32> to vector<8x128xf32>
    %20 = arith.mulf %8, %19 : vector<8x128xf32>
    %c0_10 = arith.constant 0 : index
    %c0_11 = arith.constant 0 : index
    %21 = vector.load %arg4[%c0_10, %c0_11] : memref<1x128xf32, #tpu.memory_space<vmem>>, vector<1x128xf32>
    %22 = vector.broadcast %21 : vector<1x128xf32> to vector<8x128xf32>
    %23 = arith.addf %20, %22 : vector<8x128xf32>
    %cst_12 = arith.constant 0.000000e+00 : f32
    %24 = vector.broadcast %cst_12 : f32 to vector<8x128xf32>
    %25 = arith.maximumf %23, %24 : vector<8x128xf32>
    %26 = tpu.iota {dimensions = array<i32: 0>} : vector<8x128xi32>
    %27 = tpu.iota {dimensions = array<i32: 1>} : vector<8x128xi32>
    %c128_i32 = arith.constant 128 : i32
    %28 = vector.broadcast %c128_i32 : i32 to vector<8x128xi32>
    %29 = arith.muli %26, %28 : vector<8x128xi32>
    %30 = arith.addi %29, %27 : vector<8x128xi32>
    %c0_13 = arith.constant 0 : index
    %31 = memref.load %arg0[%c0_13] : memref<1xi32, #tpu.memory_space<smem>>
    %c-1640531527_i32 = arith.constant -1640531527 : i32
    %32 = arith.muli %31, %c-1640531527_i32 : i32
    %33 = vector.broadcast %32 : i32 to vector<8x128xi32>
    %34 = arith.addi %30, %33 : vector<8x128xi32>
    %c16_i32 = arith.constant 16 : i32
    %35 = vector.broadcast %c16_i32 : i32 to vector<8x128xi32>
    %36 = arith.shrui %34, %35 : vector<8x128xi32>
    %37 = arith.xori %34, %36 : vector<8x128xi32>
    %c-2048144789_i32 = arith.constant -2048144789 : i32
    %38 = vector.broadcast %c-2048144789_i32 : i32 to vector<8x128xi32>
    %39 = arith.muli %37, %38 : vector<8x128xi32>
    %c13_i32 = arith.constant 13 : i32
    %40 = vector.broadcast %c13_i32 : i32 to vector<8x128xi32>
    %41 = arith.shrui %39, %40 : vector<8x128xi32>
    %42 = arith.xori %39, %41 : vector<8x128xi32>
    %c-1028477387_i32 = arith.constant -1028477387 : i32
    %43 = vector.broadcast %c-1028477387_i32 : i32 to vector<8x128xi32>
    %44 = arith.muli %42, %43 : vector<8x128xi32>
    %c16_i32_14 = arith.constant 16 : i32
    %45 = vector.broadcast %c16_i32_14 : i32 to vector<8x128xi32>
    %46 = arith.shrui %44, %45 : vector<8x128xi32>
    %47 = arith.xori %44, %46 : vector<8x128xi32>
    %c429496730_i32 = arith.constant 429496730 : i32
    %48 = vector.broadcast %c429496730_i32 : i32 to vector<8x128xi32>
    %49 = arith.cmpi uge, %47, %48 : vector<8x128xi32>
    %cst_15 = arith.constant 1.11111116 : f32
    %50 = vector.broadcast %cst_15 : f32 to vector<8x128xf32>
    %51 = arith.mulf %25, %50 : vector<8x128xf32>
    %cst_16 = arith.constant 0.000000e+00 : f32
    %52 = vector.broadcast %cst_16 : f32 to vector<8x128xf32>
    %53 = arith.select %49, %51, %52 : vector<8x128xi1>, vector<8x128xf32>
    %c0_17 = arith.constant 0 : index
    %c0_18 = arith.constant 0 : index
    %54 = vector.load %arg5[%c0_17, %c0_18] : memref<8x128xf32, #tpu.memory_space<vmem>>, vector<8x128xf32>
    tpu.vector_store %arg5[%c0_17, %c0_18], %53 {strides = array<i32>} : memref<8x128xf32, #tpu.memory_space<vmem>>, vector<8x128xf32>,
    return
  }
}

</mosaic_0001>

<bundles_post_ra>
// kernel: tpu_custom_call.1
= control target key start
LH: loop header
LB: loop body
LE: loop exit
PB: predicated region body
PF: predicated region fallthrough
CT: control target
= control target key end

     0   :  { %11 = vsyncpa [#allocation4], 0  ;;  %s398_s0 = inlined_call_operand.<no memory space> [shape: s32[1], index: 0, kind: input, shape index: {}]   ;;  %s399_s1 = inlined_call_operand.hbm [shape: f32[8,32], index: 1, kind: input, shape index: {}]   ;;  %s400_s2 = inlined_call_operand.hbm [shape: f32[32,128], index: 2, kind: input, shape index: {}]   ;;  %s401_s3 = inlined_call_operand.vmem [shape: f32[1,128], index: 3, kind: input, shape index: {}]   ;;  %s402_s4 = inlined_call_operand.vmem [shape: f32[1,128], index: 4, kind: input, shape index: {}]   ;;  %s403_s5 = inlined_call_operand.hbm [shape: f32[8,128], index: 5, kind: output, shape index: {}]  }
   0x1   :  { %12 = vsyncpa [#allocation7], 0 }
   0x2   :  { %13 = vsyncpa [#allocation5], 0  ;;  %s308_s18 = smov [#allocation3]   ;;  %s309_s20 = smov [#allocation6]  }
   0x3   :  { %s22_s19 = sshll.u32 %s308_s18, 4  ;;  %s31_s21 = sshll.u32 %s309_s20, 4  ;;  %s23_s19 = int_to_ptr.vmem [resolvable:$true] %s22_s19  ;;  %s346_s21 = int_to_ptr.vmem [resolvable:$true] %s31_s21 }
   0x4   :  { %s236_s24 = scalar_lea.hbm %s399_s1, 128 }
   0x5   :  { %p237_p0 = scmp.ne.s32.totalorder %s399_s1, %s236_s24  ;;  %p240_p1 = scmp.lt.u32.totalorder %s236_s24, %s399_s1 }
   0x7   :  { %p242_p2 = pnand %p240_p1, %p237_p0 }
   0x9   :  { %245 = shalt.err (!%p242_p2)
}
   0xa   :  { %s246_s29 = scalar_lea.vmem %s23_s19, 128  ;;  %p251_p4 = scmp.lt.s32.totalorder %s23_s19, %s23_s19 }
   0xb   :  { %p247_p3 = scmp.ne.s32.totalorder %s23_s19, %s246_s29  ;;  %p252_p5 = scmp.lt.s32.totalorder %s246_s29, %s246_s29 }
   0xd   :  { %p253_p6 = por %p252_p5, %p251_p4 }
   0xf   :  { %p254_p7 = pnand %p253_p6, %p247_p3 }
  0x11   :  { %257 = shalt.err (!%p254_p7)
}
  0x12   :  { %25 = dma.hbm_to_vmem [thread:$0]  %s399_s1, 128, %s23_s19, [#allocation4]  }
  0x13   :  { %s258_s9 = scalar_lea.hbm %s400_s2, 512 }
  0x14   :  { %p259_p8 = scmp.ne.s32.totalorder %s400_s2, %s258_s9  ;;  %p262_p9 = scmp.lt.u32.totalorder %s258_s9, %s400_s2 }
  0x16   :  { %p264_p10 = pnand %p262_p9, %p259_p8 }
  0x18   :  { %267 = shalt.err (!%p264_p10)
}
  0x19   :  { %s268_s14 = scalar_lea.vmem %s346_s21, 512  ;;  %p273_p12 = scmp.lt.s32.totalorder %s346_s21, %s346_s21 }
  0x1a   :  { %p269_p11 = scmp.ne.s32.totalorder %s346_s21, %s268_s14  ;;  %p274_p13 = scmp.lt.s32.totalorder %s268_s14, %s268_s14 }
  0x1c   :  { %p275_p0 = por %p274_p13, %p273_p12 }
  0x1e   :  { %p276_p1 = pnand %p275_p0, %p269_p11 }
  0x20   :  { %279 = shalt.err (!%p276_p1)
}
  0x21   :  { %s310_s1 = smov 128   ;;  %s311_s15 = smov 8  }
  0x22   :  { %37 = dma.hbm_to_vmem [thread:$0]  %s400_s2, 512, %s346_s21, [#allocation7], %s310_s1, %s310_s1, %s311_s15  }
  0x23   :  { %302 = dma.done.wait [#allocation4], 128  }
  0x24   :  { %303 = vsyncadd [#allocation4], 4294967168 }
  0x25   :  { %304 = dma.done.wait [#allocation7], 512  }
  0x26   :  { %305 = vsyncadd [#allocation7], 4294966784  ;;  %v312_v0 = vmov 0.0|0.0   ;;  %vm313_vm0 = vmmov 0   ;;  %v314_v1 = vmov 0.0   ;;  %v49_v2 = vld [vmem:[#allocation6] sm:$0xff]  ;;  %v149_v13 = vlaneseq }
  0x27   :  { %220 = vmatprep.subr.bf16.mxu0 %v312_v0  ;;  %217 = vmatprep.mubr.msk.f32.mxu0 %vm313_vm0, %v314_v1  ;;  %v50_v3 = vld [vmem:[#allocation6 + $0x8] sm:$0xff]  ;;  %v51_v4 = vld [vmem:[#allocation6 + $0x10] sm:$0xff]  ;;  %v52_v6 = vld [vmem:[#allocation6 + $0x18] sm:$0xff]  ;;  %vm53_vm1 = vcmask 261120   ;;  %s171_s19 = smul.u32 2654435769, %s398_s0 }
  0x28   :  { %v221_v5 = vpack.c.bf16 %v50_v3, %v49_v2  ;;  %v224_v7 = vpack.c.bf16 %v52_v6, %v51_v4  ;;  %v48_v8 = vld [vmem:[#allocation3] sm:$0xff]  ;;  %v150_v16 = vshrl.u32 %v149_v13, 7  ;;  %v167_v20 = vand.u32 127, %v149_v13  ;;  %s315_s23 = smov [#allocation8]  }
  0x29   :  { %v172_v24 = vstv %s171_s19  ;;  %v144_v40 = vld [vmem:[%s401_s3] sm:$0x1]  ;;  %s192_s24 = sshll.u32 %s315_s23, 4  ;;  %s193_s24 = int_to_ptr.vmem [resolvable:$true] %s192_s24 }
  0x2a   :  { %222 = vmatpush3.bf16.msra.mxu0 %v221_v5  ;;  %v168_v19 = vmul.u32 128, %v150_v16  ;;  %v151_v42 = vsub.s32 0, %v150_v16  ;;  %v203_v47 = vld [vmem:[%s402_s4] ss:$0 sm:$0xff]  ;;  %s280_s3 = scalar_lea.vmem %s193_s24, 128  ;;  %p285_p3 = scmp.lt.s32.totalorder %s193_s24, %s193_s24 }
  0x2b   :  { %223 = vmatprep.subr.bf16.mxu0 %v312_v0  ;;  %p281_p2 = scmp.ne.s32.totalorder %s193_s24, %s280_s3  ;;  %p286_p4 = scmp.lt.s32.totalorder %s280_s3, %s280_s3 }
  0x2c   :  { %v169_v23 = vadd.s32 %v168_v19, %v167_v20 }
  0x2d   :  { %p287_p5 = por %p286_p4, %p285_p3 }
  0x2e   :  { %225 = vmatpush3.bf16.msra.mxu0 %v224_v7  ;;  %v173_v27 = vadd.s32 %v172_v24, %v169_v23 }
  0x2f   :  { %p288_p6 = pnand %p287_p5, %p281_p2 }
  0x30   :  { %v174_v30 = vshrl.u32 %v173_v27, 16 }
  0x31   :  { %218 = vmatmul.mubr.msk.f32.vlgmr.msra.gmra.mrb[0].mxu0 %vm53_vm1, %v48_v8 }
  0x32   :  { %v175_v33 = vxor.u32 %v174_v30, %v173_v27 }
  0x34   :  { %v176_v36 = vmul.u32 2246822507, %v175_v33 }
  0x36   :  { %v177_v38 = vshrl.u32 %v176_v36, 13 }
  0x38   :  { %v178_v39 = vxor.u32 %v177_v38, %v176_v36 }
  0x3a   :  { %v179_v41 = vmul.u32 3266489909, %v178_v39 }
  0x3c   :  { %v180_v45 = vshrl.u32 %v179_v41, 16 }
  0x3e   :  { %v181_v49 = vxor.u32 %v180_v45, %v179_v41 }
  0x40   :  { %vm182_vm2 = vcmp.ge.u32.totalorder %v181_v49, 429496730 }
 0x104   :  { %v123_v9 = vpop.f32.mrb[0].mxu0 }
 0x105   :  { %v127_v10 = vrot.slane %v123_v9, 4  ;;  %v219_v11 = vpop.f32.mrb[1].mxu0 }
 0x107   :  { %v128_v12 = vadd.f32 %v127_v10, %v123_v9 }
 0x109   :  { %v129_v14 = vrot.slane %v128_v12, 2 }
 0x10b   :  { %v130_v15 = vadd.f32 %v129_v14, %v128_v12 }
 0x10d   :  { %v131_v17 = vrot.slane %v130_v15, 1 }
 0x10f   :  { %v132_v18 = vadd.f32 %v131_v17, %v130_v15 }
 0x111   :  { %v134_v21 = vmul.f32 0.125, %v132_v18 }
 0x113   :  { %v135_v22 = vsub.f32 %v123_v9, %v134_v21 }
 0x115   :  { %v136_v25 = vmul.f32 %v135_v22, %v135_v22 }
 0x117   :  { %v137_v26 = vrot.slane %v136_v25, 4 }
 0x119   :  { %v138_v28 = vadd.f32 %v137_v26, %v136_v25 }
 0x11b   :  { %v139_v29 = vrot.slane %v138_v28, 2 }
 0x11d   :  { %v140_v31 = vadd.f32 %v139_v29, %v138_v28 }
 0x11f   :  { %v141_v32 = vrot.slane %v140_v31, 1 }
 0x121   :  { %v142_v34 = vadd.f32 %v141_v32, %v140_v31 }
 0x123   :  { %v143_v35 = vmul.f32 0.125, %v142_v34 }
 0x125   :  { %v145_v37 = vadd.f32 1e-05, %v143_v35 }
 0x127   :  { %234 = vrsqrt.f32 %v145_v37 }
 0x131   :  { %v235_v43 = vpop.eup %234 }
 0x132   :  { %v147_v44 = vmul.f32 %v235_v43, %v144_v40 }
 0x134   :  { %v152_v46 = vrot.slane %v147_v44, %v151_v42 }
 0x136   :  { %v154_v48 = vmul.f32 %v152_v46, %v135_v22 }
 0x138   :  { %v162_v50 = vadd.f32 %v203_v47, %v154_v48 }
 0x13a   :  { %v163_v51 = vmax.f32 %v162_v50, 0.0 }
 0x13c   :  { %v183_v52 = vmul.f32 1.1111112, %v163_v51 }
 0x13e   :  { %v184_v53 = vsel %vm182_vm2, %v183_v52, 0.0 }
 0x13f   :  { %185 = vst [vmem:[#allocation8] sm:$0xff] %v184_v53 }
 0x140   :  { %291 = shalt.err (!%p288_p6)
}
 0x141   :  { %s292_s26 = scalar_lea.hbm %s403_s5, 128 }
 0x142   :  { %p293_p7 = scmp.ne.s32.totalorder %s403_s5, %s292_s26  ;;  %p296_p8 = scmp.lt.u32.totalorder %s292_s26, %s403_s5 }
 0x144   :  { %p298_p9 = pnand %p296_p8, %p293_p7 }
 0x146   :  { %301 = shalt.err (!%p298_p9)
}
 0x147   :  { %195 = dma.vmem_to_hbm [thread:$0]  %s193_s24, 128, %s403_s5, [#allocation5]  }
 0x148   :  { %306 = dma.done.wait [#allocation5], 128  }
 0x149   :  { %307 = vsyncadd [#allocation5], 4294967168 }
 0x14a   :  { %199 = vsyncpa [#allocation4], 1 }
 0x14b   :  { %200 = vsyncpa [#allocation7], 1 }
 0x14c   :  { %201 = vsyncpa [#allocation5], 1 }

</bundles_post_ra>
